<compile_context>
chip_gen: v5e
topology: v5e:2x2
jax: 0.10.0
libtpu: 0.0.40
codegen_flags: <defaults>
</compile_context>

<pallas_src>
import jax
import jax.numpy as jnp
from jax.experimental import pallas as pl
from jax.experimental.pallas import tpu as pltpu


def _linear_vpu(x, h, wt_ref, b_ref):
    """z = x @ W^T + b + h via unrolled VPU multiply-adds (no MXU).

    x      : (B, F) value
    h      : (B, F) value (float32)
    wt_ref : (F, F) ref holding W^T  (row k = weights of input feature k)
    b_ref  : (1, F) ref (bias, kept 2-D for TPU-friendly layout)
    """
    f_in = wt_ref.shape[0]
    z = h + b_ref[...]                       # bias broadcast over batch rows
    # F (=4) unrolled FMAs on one (sub-)vreg; frees the MXU/vex slot entirely.
    for k in range(f_in):
        z = z + x[:, k:k + 1] * wt_ref[k:k + 1, :]
    return z


def mycell_kernel(x_ref, h_ref, wt_ref, b_ref, o_ref):
    """Single-step fused Linear + add-hidden + tanh (dg == Identity)."""
    z = _linear_vpu(x_ref[...], h_ref[...], wt_ref, b_ref)
    o_ref[...] = jnp.tanh(z).astype(o_ref.dtype)


@jax.jit
def mycell_forward(x, h, wt, b2):
    """One MyCell step.  `wt` (= W^T) and `b2` (= b[None, :]) are prepared
    ONCE at parameter-init time, not per call.  Returns (new_h, new_h)."""
    B, F = x.shape
    new_h = pl.pallas_call(
        mycell_kernel,
        out_shape=jax.ShapeDtypeStruct((B, F), x.dtype),
        # No grid: everything is tiny and resident in VMEM.
        in_specs=[
            pl.BlockSpec(memory_space=pltpu.MemorySpace.VMEM),  # x
            pl.BlockSpec(memory_space=pltpu.MemorySpace.VMEM),  # h
            pl.BlockSpec(memory_space=pltpu.MemorySpace.VMEM),  # W^T
            pl.BlockSpec(memory_space=pltpu.MemorySpace.VMEM),  # bias (1, F)
        ],
        out_specs=pl.BlockSpec(memory_space=pltpu.MemorySpace.VMEM),
    )(x, h, wt, b2)
    return new_h, new_h


def mycell_seq_kernel(x_ref, h0_ref, wt_ref, b_ref, o_ref, h_acc):
    """Grid axis 0 = timestep.  The hidden state lives in VMEM scratch for the
    whole sequence; W^T / bias are pinned to block (0, 0) so they stay
    resident and are DMA'd from HBM only once."""
    t = pl.program_id(0)

    @pl.when(t == 0)
    def _():
        h_acc[...] = h0_ref[...].astype(jnp.float32)

    z = _linear_vpu(x_ref[0].astype(jnp.float32), h_acc[...], wt_ref, b_ref)
    new_h = jnp.tanh(z)
    h_acc[...] = new_h
    o_ref[0] = new_h.astype(o_ref.dtype)


@jax.jit
def mycell_sequence(xs, h0, wt, b2):
    """Run T MyCell steps in ONE pallas_call.  xs: (T, B, F).
    Returns the (T, B, F) stack of hidden states (row t == new_h of step t)."""
    T, B, F = xs.shape
    return pl.pallas_call(
        mycell_seq_kernel,
        out_shape=jax.ShapeDtypeStruct((T, B, F), xs.dtype),
        grid=(T,),
        in_specs=[
            pl.BlockSpec((1, B, F), lambda t: (t, 0, 0)),  # x_t (streamed)
            pl.BlockSpec((B, F), lambda t: (0, 0)),        # h0   (resident)
            pl.BlockSpec((F, F), lambda t: (0, 0)),        # W^T  (resident)
            pl.BlockSpec((1, F), lambda t: (0, 0)),        # bias (resident)
        ],
        out_specs=pl.BlockSpec((1, B, F), lambda t: (t, 0, 0)),
        scratch_shapes=[pltpu.VMEM((B, F), jnp.float32)],   # carried hidden h
        # The timestep axis carries state -> sequential ("arbitrary").  If many
        # independent cells/batches were packed on an extra leading grid axis,
        # that axis would be marked "parallel" to engage both v7x TensorCores.
        compiler_params=pltpu.CompilerParams(
            dimension_semantics=("arbitrary",)),
    )(xs, h0, wt, b2)


if __name__ == "__main__":
    key = jax.random.PRNGKey(0)
    kx, kh, kw, kb, ks = jax.random.split(key, 5)

    B, F, T = 3, 4, 8  # matches torch.rand(3, 4) and nn.Linear(4, 4); T for RNN demo
    x = jax.random.uniform(kx, (B, F), dtype=jnp.float32)
    h = jax.random.uniform(kh, (B, F), dtype=jnp.float32)

    # Deterministic "parameters" mimicking nn.Linear(4, 4) init shapes:
    #   weight: (out_features=4, in_features=4), bias: (4,)
    bound = 1.0 / jnp.sqrt(jnp.float32(F))
    w = jax.random.uniform(kw, (F, F), dtype=jnp.float32, minval=-bound, maxval=bound)
    b = jax.random.uniform(kb, (F,), dtype=jnp.float32, minval=-bound, maxval=bound)

    # Parameter prep done ONCE (hoisted out of the per-step forward path).
    wt = jnp.transpose(w)      # (in, out): kernel contracts x[:, k] * wt[k, :]
    b2 = b.reshape(1, F)

    # --- single step (matches MyCell.forward exactly) ---
    new_h, new_h_dup = mycell_forward(x, h, wt, b2)
    jax.block_until_ready(new_h)
    jax.block_until_ready(new_h_dup)

    ref = jnp.tanh(x @ w.T + b + h)
    assert jnp.allclose(new_h, ref, atol=1e-5, rtol=1e-5)
    assert jnp.allclose(new_h_dup, ref, atol=1e-5, rtol=1e-5)

    # --- sequence-fused variant (T steps, one kernel launch) ---
    xs = jax.random.uniform(ks, (T, B, F), dtype=jnp.float32)
    hs = mycell_sequence(xs, h, wt, b2)
    jax.block_until_ready(hs)

    h_ref = h
    for t in range(T):
        h_ref = jnp.tanh(xs[t] @ w.T + b + h_ref)
        assert jnp.allclose(hs[t], h_ref, atol=1e-5, rtol=1e-5)

    print("KERNEL_OK")
</pallas_src>

<mosaic_0001>
module attributes {stable_mosaic.version = 11 : i64} {
  func.func @mycell_kernel(%arg0: memref<3x4xf32, #tpu.memory_space<vmem>>, %arg1: memref<3x4xf32, #tpu.memory_space<vmem>>, %arg2: memref<4x4xf32, #tpu.memory_space<vmem>>, %arg3: memref<1x4xf32, #tpu.memory_space<vmem>>, %arg4: memref<3x4xf32, #tpu.memory_space<vmem>>) attributes {dimension_semantics = [], scalar_prefetch = 0 : i64, scratch_operands = 0 : i64, tpu.core_type = #tpu.core_type<tc>} {
    %c0 = arith.constant 0 : index
    %c0_0 = arith.constant 0 : index
    %0 = vector.load %arg0[%c0, %c0_0] : memref<3x4xf32, #tpu.memory_space<vmem>>, vector<3x4xf32>
    %c0_1 = arith.constant 0 : index
    %c0_2 = arith.constant 0 : index
    %1 = vector.load %arg1[%c0_1, %c0_2] : memref<3x4xf32, #tpu.memory_space<vmem>>, vector<3x4xf32>
    %c0_3 = arith.constant 0 : index
    %c0_4 = arith.constant 0 : index
    %2 = vector.load %arg3[%c0_3, %c0_4] : memref<1x4xf32, #tpu.memory_space<vmem>>, vector<1x4xf32>
    %3 = vector.broadcast %2 : vector<1x4xf32> to vector<3x4xf32>
    %4 = arith.addf %1, %3 : vector<3x4xf32>
    %5 = vector.extract_strided_slice %0 {offsets = [0, 0], sizes = [3, 1], strides = [1, 1]} : vector<3x4xf32> to vector<3x1xf32>
    %c0_5 = arith.constant 0 : index
    %c0_6 = arith.constant 0 : index
    %6 = vector.load %arg2[%c0_5, %c0_6] : memref<4x4xf32, #tpu.memory_space<vmem>>, vector<1x4xf32>
    %7 = vector.broadcast %5 : vector<3x1xf32> to vector<3x4xf32>
    %8 = vector.broadcast %6 : vector<1x4xf32> to vector<3x4xf32>
    %9 = arith.mulf %7, %8 : vector<3x4xf32>
    %10 = arith.addf %4, %9 : vector<3x4xf32>
    %11 = vector.extract_strided_slice %0 {offsets = [0, 1], sizes = [3, 1], strides = [1, 1]} : vector<3x4xf32> to vector<3x1xf32>
    %c1 = arith.constant 1 : index
    %c0_7 = arith.constant 0 : index
    %12 = vector.load %arg2[%c1, %c0_7] : memref<4x4xf32, #tpu.memory_space<vmem>>, vector<1x4xf32>
    %13 = vector.broadcast %11 : vector<3x1xf32> to vector<3x4xf32>
    %14 = vector.broadcast %12 : vector<1x4xf32> to vector<3x4xf32>
    %15 = arith.mulf %13, %14 : vector<3x4xf32>
    %16 = arith.addf %10, %15 : vector<3x4xf32>
    %17 = vector.extract_strided_slice %0 {offsets = [0, 2], sizes = [3, 1], strides = [1, 1]} : vector<3x4xf32> to vector<3x1xf32>
    %c2 = arith.constant 2 : index
    %c0_8 = arith.constant 0 : index
    %18 = vector.load %arg2[%c2, %c0_8] : memref<4x4xf32, #tpu.memory_space<vmem>>, vector<1x4xf32>
    %19 = vector.broadcast %17 : vector<3x1xf32> to vector<3x4xf32>
    %20 = vector.broadcast %18 : vector<1x4xf32> to vector<3x4xf32>
    %21 = arith.mulf %19, %20 : vector<3x4xf32>
    %22 = arith.addf %16, %21 : vector<3x4xf32>
    %23 = vector.extract_strided_slice %0 {offsets = [0, 3], sizes = [3, 1], strides = [1, 1]} : vector<3x4xf32> to vector<3x1xf32>
    %c3 = arith.constant 3 : index
    %c0_9 = arith.constant 0 : index
    %24 = vector.load %arg2[%c3, %c0_9] : memref<4x4xf32, #tpu.memory_space<vmem>>, vector<1x4xf32>
    %25 = vector.broadcast %23 : vector<3x1xf32> to vector<3x4xf32>
    %26 = vector.broadcast %24 : vector<1x4xf32> to vector<3x4xf32>
    %27 = arith.mulf %25, %26 : vector<3x4xf32>
    %28 = arith.addf %22, %27 : vector<3x4xf32>
    %29 = math.tanh %28 : vector<3x4xf32>
    %c0_10 = arith.constant 0 : index
    %c0_11 = arith.constant 0 : index
    %30 = vector.load %arg4[%c0_10, %c0_11] : memref<3x4xf32, #tpu.memory_space<vmem>>, vector<3x4xf32>
    tpu.vector_store %arg4[%c0_10, %c0_11], %29 {strides = array<i32>} : memref<3x4xf32, #tpu.memory_space<vmem>>, vector<3x4xf32>,
    return
  }
}

</mosaic_0001>

<bundles_post_ra>
// kernel: mycell_forward.1
= control target key start
LH: loop header
LB: loop body
LE: loop exit
PB: predicated region body
PF: predicated region fallthrough
CT: control target
= control target key end

     0   :  { %9 = vsyncpa [#allocation3], 0  ;;  %s249_s0 = inlined_call_operand.hbm [shape: f32[3,4], index: 0, kind: input, shape index: {}]   ;;  %s250_s1 = inlined_call_operand.hbm [shape: f32[3,4], index: 1, kind: input, shape index: {}]   ;;  %s251_s2 = inlined_call_operand.hbm [shape: f32[4,4], index: 2, kind: input, shape index: {}]   ;;  %s252_s3 = inlined_call_operand.vmem [shape: f32[1,4], index: 3, kind: input, shape index: {}]   ;;  %s253_s4 = inlined_call_operand.vmem [shape: f32[3,4], index: 4, kind: output, shape index: {}]  }
   0x1   :  { %10 = vsyncpa [#allocation5], 0  ;;  %s27_s17 = sshll.u32 %s250_s1, 4  ;;  %s202_s18 = smov [#allocation4]   ;;  %s28_s17 = int_to_ptr.hbm [resolvable:$true] %s27_s17 }
   0x2   :  { %s29_s19 = sshll.u32 %s202_s18, 4  ;;  %s16_s22 = sshll.u32 %s249_s0, 4  ;;  %s30_s19 = int_to_ptr.vmem [resolvable:$true] %s29_s19  ;;  %s17_s22 = int_to_ptr.hbm [resolvable:$true] %s16_s22 }
   0x3   :  { %32 = dma.hbm_to_vmem [thread:$0]  %s28_s17, 64, %s30_s19, [#allocation5]  }
   0x4   :  { %s203_s23 = smov [#allocation2]   ;;  %s38_s27 = sshll.u32 %s251_s2, 4  ;;  %s39_s27 = int_to_ptr.hbm [resolvable:$true] %s38_s27 }
   0x5   :  { %s18_s24 = sshll.u32 %s203_s23, 4  ;;  %s204_s1 = smov [#allocation6]   ;;  %s19_s24 = int_to_ptr.vmem [resolvable:$true] %s18_s24 }
   0x6   :  { %21 = dma.hbm_to_vmem [thread:$0]  %s17_s22, 64, %s19_s24, [#allocation3]  }
   0x7   :  { %s40_s28 = sshll.u32 %s204_s1, 4  ;;  %s41_s28 = int_to_ptr.vmem [resolvable:$true] %s40_s28 }
   0x8   :  { %43 = dma.hbm_to_vmem [thread:$0]  %s39_s27, 64, %s41_s28, [#allocation5]  }
   0x9   :  { %198 = dma.done.wait [#allocation3], 64  }
   0xa   :  { %199 = vsyncadd [#allocation3], 4294967232 }
   0xb   :  { %200 = dma.done.wait [#allocation5], 128  }
   0xc   :  { %201 = vsyncadd [#allocation5], 4294967168  ;;  %v205_v0 = vmov 0   ;;  %v206_v1 = vmov 2   ;;  %v58_v2 = vld [vmem:[#allocation2] sm:$0x7] }
   0xd   :  { %114 = vset.pattern.permute.xlu0 %v205_v0  ;;  %116 = vset.pattern.permute.xlu1 %v206_v1  ;;  %v207_v3 = vmov 1   ;;  %v208_v4 = vmov 3   ;;  %v119_v7 = vld [vmem:[%s252_s3] ss:$0 sm:$0xff]  ;;  %v120_v8 = vld [vmem:[#allocation6] ss:$0 sm:$0xff] }
   0xe   :  { %68 = vperm.xlu0 %114, %v58_v2   ;;  %84 = vperm.xlu1 %116, %v58_v2   ;;  %v59_v9 = vld [vmem:[#allocation4] sm:$0x7]  ;;  %v122_v12 = vld [vmem:[#allocation6 + $0x1] ss:$0 sm:$0xff]  ;;  %v121_v13 = vld [vmem:[#allocation6 + $0x2] ss:$0 sm:$0xff] }
   0xf   :  { %v64_v10 = vadd.f32 %v119_v7, %v59_v9  ;;  %v123_v14 = vld [vmem:[#allocation6 + $0x3] ss:$0 sm:$0xff]  ;;  %vm99_vm0 = vcmask 26624  }
  0x16   :  { %115 = vset.pattern.permute.xlu0 %v207_v3  ;;  %117 = vset.pattern.permute.xlu1 %v208_v4 }
  0x17   :  { %76 = vperm.xlu0 %115, %v58_v2   ;;  %92 = vperm.xlu1 %117, %v58_v2  }
  0x1f   :  { %118 = vset.pattern.permute.xlu0 %v208_v4 }
  0x80   :  { %v69_v5 = vpop.permute.xlu0 %68  ;;  %v85_v6 = vpop.permute.xlu1 %84 }
  0x81   :  { %v72_v11 = vmul.f32 %v120_v8, %v69_v5  ;;  %v88_v19 = vmul.f32 %v121_v13, %v85_v6 }
  0x83   :  { %v73_v17 = vadd.f32 %v72_v11, %v64_v10 }
  0x89   :  { %v77_v15 = vpop.permute.xlu0 %76  ;;  %v93_v16 = vpop.permute.xlu1 %92 }
  0x8a   :  { %v80_v18 = vmul.f32 %v122_v12, %v77_v15  ;;  %v96_v21 = vmul.f32 %v123_v14, %v93_v16 }
  0x8c   :  { %v81_v20 = vadd.f32 %v80_v18, %v73_v17 }
  0x8e   :  { %v89_v22 = vadd.f32 %v88_v19, %v81_v20 }
  0x90   :  { %v97_v23 = vadd.f32 %v96_v21, %v89_v22 }
  0x92   :  { %124 = vtanh.f32 %v97_v23 }
  0x98   :  { %v125_v24 = vpop.eup %124 }
  0x99   :  { %100 = vst.msk [vmem:[%s253_s4] sm:$0x7] %vm99_vm0, %v125_v24 }
  0x9a   :  { %105 = vsyncpa [#allocation3], 1 }
  0x9b   :  { %106 = vsyncpa [#allocation5], 1 }

</bundles_post_ra>
